<compile_context>
chip_gen: v7x
topology: tpu7x:2x2x1
jax: 0.10.0
libtpu: 0.0.40
codegen_flags: <defaults>
</compile_context>

<pallas_src>
import jax
import jax.numpy as jnp
from jax.experimental import pallas as pl
from jax.experimental.pallas import tpu as pltpu

MAX_ACTION_DIM = 3
MAX_STATE_DIM = 6
LANE = 128
S_NARROW = 16  # narrow input width (real 6 features, padded to 16 for clean tiling)


def _round_up(n, m):
    return ((n + m - 1) // m) * m


def _target_tile_b():
    """Bigger tiles on 128-MiB VMEM parts (v5e/v6e); 512 on v7x (64 MiB)."""
    try:
        info = pltpu.get_tpu_info()
        if info.vmem_capacity_bytes >= (96 << 20):
            return 1024
    except Exception:
        pass
    return 512


# ----------------------------------------------------------------------------- kernel


def _make_kernel(output_dim, is_continuous):
    """Fused ProgressiveNetwork forward: 3 matmuls, single packed output."""

    def kernel(x_ref, w1_ref, b1_ref, w2_ref, b2_ref, w3_ref, bf_ref, out_ref):
        x = x_ref[...].astype(jnp.bfloat16)                       # [TILE_B, 16]

        # Layer 1 of all sub-networks at once (column-concatenated W1).
        h1 = jnp.dot(x, w1_ref[...], preferred_element_type=jnp.float32) + b1_ref[...]
        h1 = jnp.maximum(h1, 0.0).astype(jnp.bfloat16)            # [TILE_B, H_tot]

        # Layer 2: block-diagonal W2 keeps the sub-networks independent.
        h2 = jnp.dot(h1, w2_ref[...], preferred_element_type=jnp.float32) + b2_ref[...]
        h2 = jnp.maximum(h2, 0.0).astype(jnp.bfloat16)            # [TILE_B, H_tot]

        # Composed layer 3: (W3 . adapters . final layers) folded offline.
        # raw lanes [0, output_dim) = final_actor logits, lane output_dim = critic.
        raw = jnp.dot(h2, w3_ref[...], preferred_element_type=jnp.float32) + bf_ref[...]

        col = jax.lax.broadcasted_iota(jnp.int32, raw.shape, 1)
        is_actor_lane = col < output_dim

        if is_continuous:
            act = jnp.tanh(raw)
        else:
            masked = jnp.where(is_actor_lane, raw, jnp.float32(-1e30))
            mx = jnp.max(masked, axis=-1, keepdims=True)
            e = jnp.exp(masked - mx)
            denom = jnp.sum(e, axis=-1, keepdims=True)
            act = e * pl.reciprocal(denom, approx=True)

        # Activated actor lanes; critic (and zero padding) lanes keep the raw value.
        out_ref[...] = jnp.where(is_actor_lane, act, raw).astype(out_ref.dtype)

    return kernel


# ----------------------------------------------------------------------------- wrapper


def progressive_forward(x, padded_params, *, output_dim, is_continuous, tile_b=None):
    """x: [B, MAX_STATE_DIM] -> (actor [B, output_dim], critic [B, 1])."""
    B = x.shape[0]
    assert B >= 1
    OF = _round_up(output_dim + 1, LANE)  # actor lanes + 1 critic lane, padded

    if tile_b is None:
        target = _target_tile_b()
        n_tiles = pl.cdiv(B, target)
        if B >= 256:
            n_tiles = max(n_tiles, 2)     # >=2 grid steps so v7x megacore can split
        tile_b = _round_up(pl.cdiv(B, n_tiles), 8)
    B_pad = _round_up(B, tile_b)
    grid = (B_pad // tile_b,)

    # Narrow, zero-padded input slab [B_pad, 16] (8x less DMA than a 128-lane slab).
    xp = jnp.zeros((B_pad, S_NARROW), jnp.float32).at[:B, :MAX_STATE_DIM].set(
        x.astype(jnp.float32))

    kernel = _make_kernel(output_dim, is_continuous)

    def resident(a):
        # Full-array block + constant index map -> VMEM-resident across grid steps.
        return pl.BlockSpec(a.shape, lambda i, _nd=a.ndim: (0,) * _nd)

    in_specs = [pl.BlockSpec((tile_b, S_NARROW), lambda i: (i, 0))] + \
               [resident(a) for a in padded_params]
    out_specs = pl.BlockSpec((tile_b, OF), lambda i: (i, 0))
    out_shape = jax.ShapeDtypeStruct((B_pad, OF), jnp.float32)

    out = pl.pallas_call(
        kernel,
        grid=grid,
        in_specs=in_specs,
        out_specs=out_specs,
        out_shape=out_shape,
        compiler_params=pltpu.CompilerParams(
            dimension_semantics=("parallel",),   # megacore on v7x, no-op on v5e/v6e
            vmem_limit_bytes=48 << 20),          # safe on v7x (64 MiB physical VMEM)
    )(xp, *padded_params)

    actor = out[:B, :output_dim]
    critic = out[:B, output_dim:output_dim + 1]
    return actor, critic


# ----------------------------------------------------------------------------- params


def init_params(key, hidden_dim, output_dim, n_src_actor, n_src_critic):
    """PyTorch nn.Linear default init: U(-1/sqrt(fan_in), 1/sqrt(fan_in)).
    Weights stored as [in, out] (PyTorch weight.T); biases as [1, out]."""
    assert n_src_actor >= 1 and n_src_critic >= 1

    def linear(k, fan_in, fan_out):
        kw, kb = jax.random.split(k)
        bound = 1.0 / (float(fan_in) ** 0.5)
        w = jax.random.uniform(kw, (fan_in, fan_out), jnp.float32, -bound, bound)
        b = jax.random.uniform(kb, (1, fan_out), jnp.float32, -bound, bound)
        return w, b

    def mlp(k, out_dim):
        k1, k2, k3 = jax.random.split(k, 3)
        w1, b1 = linear(k1, MAX_STATE_DIM, hidden_dim)
        w2, b2 = linear(k2, hidden_dim, hidden_dim)
        w3, b3 = linear(k3, hidden_dim, out_dim)
        return (w1, b1, w2, b2, w3, b3)

    n_keys = (1 + n_src_actor) + (1 + n_src_critic) + n_src_actor + n_src_critic + 2
    ki = iter(jax.random.split(key, n_keys))
    return {
        "actor_mlps": [mlp(next(ki), MAX_ACTION_DIM) for _ in range(1 + n_src_actor)],
        "critic_mlps": [mlp(next(ki), 1) for _ in range(1 + n_src_critic)],
        "actor_adapters": [linear(next(ki), MAX_ACTION_DIM, hidden_dim) for _ in range(n_src_actor)],
        "critic_adapters": [linear(next(ki), 1, hidden_dim) for _ in range(n_src_critic)],
        "final_actor": linear(next(ki), MAX_ACTION_DIM + hidden_dim * n_src_actor, output_dim),
        "final_critic": linear(next(ki), 1 + hidden_dim * n_src_critic, 1),
    }


def pad_params(params, hidden_dim, output_dim):
    """Fuse & fold all weights offline (f32), then cast matmul weights to bf16.

    Returns (w1_all, b1_all, w2_all, b2_all, w3_comp, b_comp):
      w1_all  [16, H_tot]      layer-1 weights of all sub-nets, column-concatenated
      w2_all  [H_tot, H_tot]   block-diagonal layer-2 weights
      w3_comp [H_tot, OF]      W3 . (adapter) . final-layer-segment, per sub-net,
                               actor nets -> lanes [0, output_dim), critics -> lane output_dim
      b_comp  [1, OF]          all downstream biases folded into one row
    Sub-network order: [target_actor, src_actors..., target_critic, src_critics...]
    """
    n_src_actor = len(params["actor_adapters"])
    n_src_critic = len(params["critic_adapters"])
    h = hidden_dim
    n_nets = (1 + n_src_actor) + (1 + n_src_critic)
    H_tot = _round_up(n_nets * h, LANE)
    OF = _round_up(output_dim + 1, LANE)

    w1_all = jnp.zeros((S_NARROW, H_tot), jnp.float32)
    b1_all = jnp.zeros((1, H_tot), jnp.float32)
    w2_all = jnp.zeros((H_tot, H_tot), jnp.float32)
    b2_all = jnp.zeros((1, H_tot), jnp.float32)
    w3_comp = jnp.zeros((H_tot, OF), jnp.float32)
    b_comp = jnp.zeros((1, OF), jnp.float32)

    wfa, bfa = params["final_actor"]    # [MAX_ACTION_DIM + h*Na, output_dim], [1, output_dim]
    wfc, bfc = params["final_critic"]   # [1 + h*Nc, 1], [1, 1]
    b_comp = b_comp.at[:, :output_dim].add(bfa)
    b_comp = b_comp.at[:, output_dim:output_dim + 1].add(bfc)

    mlps = params["actor_mlps"] + params["critic_mlps"]
    for m, (w1, b1, w2, b2, w3, b3) in enumerate(mlps):
        lo, hi = m * h, (m + 1) * h
        w1_all = w1_all.at[:MAX_STATE_DIM, lo:hi].set(w1)
        b1_all = b1_all.at[:, lo:hi].set(b1)
        w2_all = w2_all.at[lo:hi, lo:hi].set(w2)
        b2_all = b2_all.at[:, lo:hi].set(b2)

        if m == 0:                                   # target actor
            wseg = wfa[:MAX_ACTION_DIM]              # [MAX_ACTION_DIM, output_dim]
            w3c, bc = w3 @ wseg, b3 @ wseg
            w3_comp = w3_comp.at[lo:hi, :output_dim].set(w3c)
            b_comp = b_comp.at[:, :output_dim].add(bc)
        elif m <= n_src_actor:                       # source actor i
            i = m - 1
            wad, bad = params["actor_adapters"][i]   # [MAX_ACTION_DIM, h], [1, h]
            wseg = wfa[MAX_ACTION_DIM + i * h: MAX_ACTION_DIM + (i + 1) * h]
            w3c = w3 @ wad @ wseg
            bc = (b3 @ wad + bad) @ wseg
            w3_comp = w3_comp.at[lo:hi, :output_dim].set(w3c)
            b_comp = b_comp.at[:, :output_dim].add(bc)
        elif m == 1 + n_src_actor:                   # target critic
            wseg = wfc[:1]                           # [1, 1]
            w3c, bc = w3 @ wseg, b3 @ wseg
            w3_comp = w3_comp.at[lo:hi, output_dim:output_dim + 1].set(w3c)
            b_comp = b_comp.at[:, output_dim:output_dim + 1].add(bc)
        else:                                        # source critic i
            i = m - (2 + n_src_actor)
            wad, bad = params["critic_adapters"][i]  # [1, h], [1, h]
            wseg = wfc[1 + i * h: 1 + (i + 1) * h]   # [h, 1]
            w3c = w3 @ wad @ wseg
            bc = (b3 @ wad + bad) @ wseg
            w3_comp = w3_comp.at[lo:hi, output_dim:output_dim + 1].set(w3c)
            b_comp = b_comp.at[:, output_dim:output_dim + 1].add(bc)

    return (w1_all.astype(jnp.bfloat16), b1_all,
            w2_all.astype(jnp.bfloat16), b2_all,
            w3_comp.astype(jnp.bfloat16), b_comp)


# ----------------------------------------------------------------------------- reference


def reference_forward(x, params, is_continuous):
    def mlp(p, xx):
        w1, b1, w2, b2, w3, b3 = p
        h1 = jnp.maximum(xx @ w1 + b1, 0.0)
        h2 = jnp.maximum(h1 @ w2 + b2, 0.0)
        return h2 @ w3 + b3

    ta = mlp(params["actor_mlps"][0], x)
    sa = [mlp(p, x) for p in params["actor_mlps"][1:]]
    tc = mlp(params["critic_mlps"][0], x)
    sc = [mlp(p, x) for p in params["critic_mlps"][1:]]
    ada = [o @ w + b for o, (w, b) in zip(sa, params["actor_adapters"])]
    adc = [o @ w + b for o, (w, b) in zip(sc, params["critic_adapters"])]
    ca = jnp.concatenate([ta] + ada, axis=-1)
    cc = jnp.concatenate([tc] + adc, axis=-1)
    wfa, bfa = params["final_actor"]
    wfc, bfc = params["final_critic"]
    logits = ca @ wfa + bfa
    actor = jnp.tanh(logits) if is_continuous else jax.nn.softmax(logits, axis=-1)
    critic = cc @ wfc + bfc
    return actor, critic


# ----------------------------------------------------------------------------- test


if __name__ == "__main__":
    key = jax.random.PRNGKey(0)
    k_params, k_x, k_x2 = jax.random.split(key, 3)

    hidden_dim = 32
    output_dim = MAX_ACTION_DIM
    n_src_actor = 2
    n_src_critic = 2
    batch = 8

    params = init_params(k_params, hidden_dim, output_dim, n_src_actor, n_src_critic)
    padded = pad_params(params, hidden_dim, output_dim)
    x = jax.random.normal(k_x, (batch, MAX_STATE_DIM), jnp.float32)

    # bf16 operands + pre-composed weights => looser tolerance than pure-f32.
    TOL = dict(atol=2e-2, rtol=2e-2)

    # Discrete head (softmax).
    actor, critic = progressive_forward(x, padded, output_dim=output_dim,
                                        is_continuous=False)
    actor = jax.block_until_ready(actor)
    critic = jax.block_until_ready(critic)
    ref_a, ref_c = reference_forward(x, params, is_continuous=False)
    assert actor.shape == (batch, output_dim)
    assert critic.shape == (batch, 1)
    assert jnp.allclose(actor, ref_a, **TOL)
    assert jnp.allclose(critic, ref_c, **TOL)

    # Continuous head (tanh).
    actor_c, critic_c = progressive_forward(x, padded, output_dim=output_dim,
                                            is_continuous=True)
    actor_c = jax.block_until_ready(actor_c)
    ref_ac, ref_cc = reference_forward(x, params, is_continuous=True)
    assert jnp.allclose(actor_c, ref_ac, **TOL)
    assert jnp.allclose(critic_c, ref_cc, **TOL)

    # Multi-tile + ragged-tail path (exercises grid > 1 and batch padding/slicing).
    batch2 = 300
    x2 = jax.random.normal(k_x2, (batch2, MAX_STATE_DIM), jnp.float32)
    a2, c2 = progressive_forward(x2, padded, output_dim=output_dim, is_continuous=False)
    a2 = jax.block_until_ready(a2)
    ref_a2, ref_c2 = reference_forward(x2, params, is_continuous=False)
    assert a2.shape == (batch2, output_dim) and c2.shape == (batch2, 1)
    assert jnp.allclose(a2, ref_a2, **TOL)
    assert jnp.allclose(c2, ref_c2, **TOL)

    print("KERNEL_OK")
</pallas_src>

<mosaic_0001>
module attributes {stable_mosaic.version = 11 : i64} {
  func.func @kernel(%arg0: i32, %arg1: memref<8x16xf32, #tpu.memory_space<vmem>>, %arg2: memref<16x256xbf16, #tpu.memory_space<vmem>>, %arg3: memref<1x256xf32, #tpu.memory_space<vmem>>, %arg4: memref<256x256xbf16, #tpu.memory_space<vmem>>, %arg5: memref<1x256xf32, #tpu.memory_space<vmem>>, %arg6: memref<256x128xbf16, #tpu.memory_space<vmem>>, %arg7: memref<1x128xf32, #tpu.memory_space<vmem>>, %arg8: memref<8x128xf32, #tpu.memory_space<vmem>>) attributes {dimension_semantics = [#tpu.dimension_semantics<parallel>], iteration_bounds = array<i64: 1>, scalar_prefetch = 0 : i64, scratch_operands = 0 : i64, tpu.core_type = #tpu.core_type<tc>, window_params = [{transform_indices = @transform_0, window_bounds = array<i64: 8, 16>}, {pipeline_mode = #tpu.pipeline_mode<synchronous>, transform_indices = @transform_1, window_bounds = array<i64: 16, 256>}, {pipeline_mode = #tpu.pipeline_mode<synchronous>, transform_indices = @transform_2, window_bounds = array<i64: 1, 256>}, {pipeline_mode = #tpu.pipeline_mode<synchronous>, transform_indices = @transform_3, window_bounds = array<i64: 256, 256>}, {pipeline_mode = #tpu.pipeline_mode<synchronous>, transform_indices = @transform_4, window_bounds = array<i64: 1, 256>}, {pipeline_mode = #tpu.pipeline_mode<synchronous>, transform_indices = @transform_5, window_bounds = array<i64: 256, 128>}, {pipeline_mode = #tpu.pipeline_mode<synchronous>, transform_indices = @transform_6, window_bounds = array<i64: 1, 128>}, {transform_indices = @transform_7, window_bounds = array<i64: 8, 128>}]} {
    %c0 = arith.constant 0 : index
    %c0_0 = arith.constant 0 : index
    %0 = vector.load %arg1[%c0, %c0_0] : memref<8x16xf32, #tpu.memory_space<vmem>>, vector<8x16xf32>
    %1 = arith.truncf %0 : vector<8x16xf32> to vector<8x16xbf16>
    %c0_1 = arith.constant 0 : index
    %c0_2 = arith.constant 0 : index
    %2 = vector.load %arg2[%c0_1, %c0_2] : memref<16x256xbf16, #tpu.memory_space<vmem>>, vector<16x256xbf16>
    %cst = arith.constant dense<0.000000e+00> : vector<8x256xf32>
    %3 = tpu.matmul %1, %2, %cst {dimension_numbers = #tpu.dot_dimension_numbers<[1], [0], [0], [1], [0, 0, 1, 1], [], []>} : vector<8x16xbf16>, vector<16x256xbf16>, vector<8x256xf32> -> vector<8x256xf32>
    %c0_3 = arith.constant 0 : index
    %c0_4 = arith.constant 0 : index
    %4 = vector.load %arg3[%c0_3, %c0_4] : memref<1x256xf32, #tpu.memory_space<vmem>>, vector<1x256xf32>
    %5 = vector.broadcast %4 : vector<1x256xf32> to vector<8x256xf32>
    %6 = arith.addf %3, %5 : vector<8x256xf32>
    %cst_5 = arith.constant 0.000000e+00 : f32
    %7 = vector.broadcast %cst_5 : f32 to vector<8x256xf32>
    %8 = arith.maximumf %6, %7 : vector<8x256xf32>
    %9 = arith.truncf %8 : vector<8x256xf32> to vector<8x256xbf16>
    %c0_6 = arith.constant 0 : index
    %c0_7 = arith.constant 0 : index
    %10 = vector.load %arg4[%c0_6, %c0_7] : memref<256x256xbf16, #tpu.memory_space<vmem>>, vector<256x256xbf16>
    %cst_8 = arith.constant dense<0.000000e+00> : vector<8x256xf32>
    %11 = tpu.matmul %9, %10, %cst_8 {dimension_numbers = #tpu.dot_dimension_numbers<[1], [0], [0], [1], [0, 0, 1, 1], [], []>} : vector<8x256xbf16>, vector<256x256xbf16>, vector<8x256xf32> -> vector<8x256xf32>
    %c0_9 = arith.constant 0 : index
    %c0_10 = arith.constant 0 : index
    %12 = vector.load %arg5[%c0_9, %c0_10] : memref<1x256xf32, #tpu.memory_space<vmem>>, vector<1x256xf32>
    %13 = vector.broadcast %12 : vector<1x256xf32> to vector<8x256xf32>
    %14 = arith.addf %11, %13 : vector<8x256xf32>
    %cst_11 = arith.constant 0.000000e+00 : f32
    %15 = vector.broadcast %cst_11 : f32 to vector<8x256xf32>
    %16 = arith.maximumf %14, %15 : vector<8x256xf32>
    %17 = arith.truncf %16 : vector<8x256xf32> to vector<8x256xbf16>
    %c0_12 = arith.constant 0 : index
    %c0_13 = arith.constant 0 : index
    %18 = vector.load %arg6[%c0_12, %c0_13] : memref<256x128xbf16, #tpu.memory_space<vmem>>, vector<256x128xbf16>
    %cst_14 = arith.constant dense<0.000000e+00> : vector<8x128xf32>
    %19 = tpu.matmul %17, %18, %cst_14 {dimension_numbers = #tpu.dot_dimension_numbers<[1], [0], [0], [1], [0, 0, 1, 1], [], []>} : vector<8x256xbf16>, vector<256x128xbf16>, vector<8x128xf32> -> vector<8x128xf32>
    %c0_15 = arith.constant 0 : index
    %c0_16 = arith.constant 0 : index
    %20 = vector.load %arg7[%c0_15, %c0_16] : memref<1x128xf32, #tpu.memory_space<vmem>>, vector<1x128xf32>
    %21 = vector.broadcast %20 : vector<1x128xf32> to vector<8x128xf32>
    %22 = arith.addf %19, %21 : vector<8x128xf32>
    %23 = tpu.iota {dimensions = array<i32: 1>} : vector<8x128xi32>
    %c3_i32 = arith.constant 3 : i32
    %24 = vector.broadcast %c3_i32 : i32 to vector<8x128xi32>
    %25 = arith.cmpi slt, %23, %24 : vector<8x128xi32>
    %cst_17 = arith.constant -1.000000e+30 : f32
    %26 = vector.broadcast %cst_17 : f32 to vector<8x128xf32>
    %27 = arith.select %25, %22, %26 : vector<8x128xi1>, vector<8x128xf32>
    %cst_18 = arith.constant dense<0xFF800000> : vector<8xf32>
    %28 = vector.multi_reduction <maximumf>, %27, %cst_18 [1] : vector<8x128xf32> to vector<8xf32>
    %29 = vector.shape_cast %28 : vector<8xf32> to vector<8x1xf32>
    %30 = vector.broadcast %29 : vector<8x1xf32> to vector<8x128xf32>
    %31 = arith.subf %27, %30 : vector<8x128xf32>
    %32 = math.exp %31 : vector<8x128xf32>
    %cst_19 = arith.constant dense<0.000000e+00> : vector<8xf32>
    %33 = vector.multi_reduction <add>, %32, %cst_19 [1] : vector<8x128xf32> to vector<8xf32>
    %34 = vector.shape_cast %33 : vector<8xf32> to vector<8x1xf32>
    %35 = tpu.reciprocal %34 {approx = true} : vector<8x1xf32> -> vector<8x1xf32>
    %36 = vector.broadcast %35 : vector<8x1xf32> to vector<8x128xf32>
    %37 = arith.mulf %32, %36 : vector<8x128xf32>
    %38 = arith.select %25, %37, %22 : vector<8x128xi1>, vector<8x128xf32>
    %c0_20 = arith.constant 0 : index
    %c0_21 = arith.constant 0 : index
    %39 = vector.load %arg8[%c0_20, %c0_21] : memref<8x128xf32, #tpu.memory_space<vmem>>, vector<8x128xf32>
    tpu.vector_store %arg8[%c0_20, %c0_21], %38 {strides = array<i32>} : memref<8x128xf32, #tpu.memory_space<vmem>>, vector<8x128xf32>,
    return
  }
  func.func @transform_0(%arg0: i32) -> (i32, i32) {
    %c0_i32 = arith.constant 0 : i32
    %c0_i32_0 = arith.constant 0 : i32
    return %arg0, %c0_i32 : i32, i32
  }
  func.func @transform_1(%arg0: i32) -> (i32, i32) {
    %c0_i32 = arith.constant 0 : i32
    %c0_i32_0 = arith.constant 0 : i32
    %c0_i32_1 = arith.constant 0 : i32
    return %c0_i32, %c0_i32_0 : i32, i32
  }
  func.func @transform_2(%arg0: i32) -> (i32, i32) {
    %c0_i32 = arith.constant 0 : i32
    %c0_i32_0 = arith.constant 0 : i32
    %c0_i32_1 = arith.constant 0 : i32
    return %c0_i32, %c0_i32_0 : i32, i32
  }
  func.func @transform_3(%arg0: i32) -> (i32, i32) {
    %c0_i32 = arith.constant 0 : i32
    %c0_i32_0 = arith.constant 0 : i32
    %c0_i32_1 = arith.constant 0 : i32
    return %c0_i32, %c0_i32_0 : i32, i32
  }
  func.func @transform_4(%arg0: i32) -> (i32, i32) {
    %c0_i32 = arith.constant 0 : i32
    %c0_i32_0 = arith.constant 0 : i32
    %c0_i32_1 = arith.constant 0 : i32
    return %c0_i32, %c0_i32_0 : i32, i32
  }
  func.func @transform_5(%arg0: i32) -> (i32, i32) {
    %c0_i32 = arith.constant 0 : i32
    %c0_i32_0 = arith.constant 0 : i32
    %c0_i32_1 = arith.constant 0 : i32
    return %c0_i32, %c0_i32_0 : i32, i32
  }
  func.func @transform_6(%arg0: i32) -> (i32, i32) {
    %c0_i32 = arith.constant 0 : i32
    %c0_i32_0 = arith.constant 0 : i32
    %c0_i32_1 = arith.constant 0 : i32
    return %c0_i32, %c0_i32_0 : i32, i32
  }
  func.func @transform_7(%arg0: i32) -> (i32, i32) {
    %c0_i32 = arith.constant 0 : i32
    %c0_i32_0 = arith.constant 0 : i32
    return %arg0, %c0_i32 : i32, i32
  }
}

</mosaic_0001>

<bundles_post_ra>
// kernel: tpu_custom_call.1
= control target key start
LH: loop header
LB: loop body
LE: loop exit
PB: predicated region body
PF: predicated region fallthrough
CT: control target
= control target key end

     0   :  { %12 = vsyncpa [#allocation3], 0  ;;  %s1012_s0 = inlined_call_operand.hbm [shape: f32[8,16], index: 0, kind: input, shape index: {}]   ;;  %s1013_s1 = inlined_call_operand.hbm [shape: bf16[16,256], index: 1, kind: input, shape index: {}]   ;;  %s1014_s2 = inlined_call_operand.vmem [shape: f32[1,256], index: 2, kind: input, shape index: {}]   ;;  %s1015_s3 = inlined_call_operand.hbm [shape: bf16[256,256], index: 3, kind: input, shape index: {}]   ;;  %s1016_s4 = inlined_call_operand.vmem [shape: f32[1,256], index: 4, kind: input, shape index: {}]   ;;  %s1017_s5 = inlined_call_operand.hbm [shape: bf16[256,128], index: 5, kind: input, shape index: {}]   ;;  %s1018_s6 = inlined_call_operand.vmem [shape: f32[1,128], index: 6, kind: input, shape index: {}]   ;;  %s1019_s7 = inlined_call_operand.hbm [shape: f32[8,128], index: 7, kind: output, shape index: {}]  }
   0x1   :  { %13 = vsyncpa [#allocation6], 0 }
   0x2   :  { %14 = vsyncpa [#allocation9], 0 }
   0x3   :  { %15 = vsyncpa [#allocation4], 0  ;;  %s885_s24 = smov [#allocation5]   ;;  %s767_s28 = scalar_lea.hbm %s1013_s1, 256 }
   0x4   :  { %s31_s25 = sshll.u32 %s885_s24, 4  ;;  %p768_p0 = scmp.ne.s32.totalorder %s1013_s1, %s767_s28  ;;  %s32_s25 = int_to_ptr.vmem [resolvable:$true] %s31_s25 }
   0x5   :  { %p771_p1 = scmp.lt.u32.totalorder %s767_s28, %s1013_s1 }
   0x7   :  { %p773_p2 = pnand %p771_p1, %p768_p0 }
   0x9   :  { %776 = shalt.err (!%p773_p2)
}
   0xa   :  { %s777_s10 = scalar_lea.vmem %s32_s25, 256  ;;  %p782_p4 = scmp.lt.s32.totalorder %s32_s25, %s32_s25 }
   0xb   :  { %p778_p3 = scmp.ne.s32.totalorder %s32_s25, %s777_s10  ;;  %p783_p5 = scmp.lt.s32.totalorder %s777_s10, %s777_s10 }
   0xd   :  { %p784_p6 = por %p783_p5, %p782_p4 }
   0xf   :  { %p785_p7 = pnand %p784_p6, %p778_p3 }
  0x11   :  { %788 = shalt.err (!%p785_p7)
}
  0x12   :  { %s886_s11 = smov 128   ;;  %s887_s12 = smov 8  }
  0x13   :  { %37 = dma.hbm_to_vmem [thread:$0]  %s1013_s1, 256, %s32_s25, [#allocation6], %s886_s11, %s886_s11, %s887_s12  }
  0x14   :  { %s888_s15 = smov [#allocation2]   ;;  %s889_s17 = smov [#allocation7]  }
  0x15   :  { %s22_s16 = sshll.u32 %s888_s15, 4  ;;  %s45_s18 = sshll.u32 %s889_s17, 4  ;;  %s23_s16 = int_to_ptr.vmem [resolvable:$true] %s22_s16  ;;  %s46_s18 = int_to_ptr.vmem [resolvable:$true] %s45_s18 }
  0x16   :  { %s789_s21 = scalar_lea.hbm %s1012_s0, 128 }
  0x17   :  { %p790_p8 = scmp.ne.s32.totalorder %s1012_s0, %s789_s21  ;;  %p793_p9 = scmp.lt.u32.totalorder %s789_s21, %s1012_s0 }
  0x19   :  { %p795_p10 = pnand %p793_p9, %p790_p8 }
  0x1b   :  { %798 = shalt.err (!%p795_p10)
}
  0x1c   :  { %s799_s1 = scalar_lea.vmem %s23_s16, 128  ;;  %p804_p12 = scmp.lt.s32.totalorder %s23_s16, %s23_s16 }
  0x1d   :  { %p800_p11 = scmp.ne.s32.totalorder %s23_s16, %s799_s1  ;;  %p805_p13 = scmp.lt.s32.totalorder %s799_s1, %s799_s1 }
  0x1f   :  { %p806_p0 = por %p805_p13, %p804_p12 }
  0x21   :  { %p807_p1 = pnand %p806_p0, %p800_p11 }
  0x23   :  { %810 = shalt.err (!%p807_p1)
}
  0x24   :  { %25 = dma.hbm_to_vmem [thread:$0]  %s1012_s0, 128, %s23_s16, [#allocation3]  }
  0x25   :  { %s811_s30 = scalar_lea.hbm %s1015_s3, 4096 }
  0x26   :  { %p812_p2 = scmp.ne.s32.totalorder %s1015_s3, %s811_s30  ;;  %p815_p3 = scmp.lt.u32.totalorder %s811_s30, %s1015_s3 }
  0x28   :  { %p817_p4 = pnand %p815_p3, %p812_p2 }
  0x2a   :  { %820 = shalt.err (!%p817_p4)
}
  0x2b   :  { %s821_s14 = scalar_lea.vmem %s46_s18, 4096  ;;  %p826_p6 = scmp.lt.s32.totalorder %s46_s18, %s46_s18 }
  0x2c   :  { %p822_p5 = scmp.ne.s32.totalorder %s46_s18, %s821_s14  ;;  %p827_p7 = scmp.lt.s32.totalorder %s821_s14, %s821_s14 }
  0x2e   :  { %p828_p8 = por %p827_p7, %p826_p6 }
  0x30   :  { %p829_p9 = pnand %p828_p8, %p822_p5 }
  0x32   :  { %832 = shalt.err (!%p829_p9)
}
  0x33   :  { %51 = dma.hbm_to_vmem [thread:$0]  %s1015_s3, 4096, %s46_s18, [#allocation6], %s886_s11, %s886_s11, %s887_s12  }
  0x34   :  { %s890_s16 = smov [#allocation8]   ;;  %s833_s21 = scalar_lea.hbm %s1017_s5, 2048 }
  0x35   :  { %s59_s17 = sshll.u32 %s890_s16, 4  ;;  %p834_p10 = scmp.ne.s32.totalorder %s1017_s5, %s833_s21  ;;  %s60_s17 = int_to_ptr.vmem [resolvable:$true] %s59_s17 }
  0x36   :  { %p837_p11 = scmp.lt.u32.totalorder %s833_s21, %s1017_s5 }
  0x38   :  { %p839_p12 = pnand %p837_p11, %p834_p10 }
  0x3a   :  { %842 = shalt.err (!%p839_p12)
}
  0x3b   :  { %s843_s1 = scalar_lea.vmem %s60_s17, 2048  ;;  %p848_p0 = scmp.lt.s32.totalorder %s60_s17, %s60_s17 }
  0x3c   :  { %p844_p13 = scmp.ne.s32.totalorder %s60_s17, %s843_s1  ;;  %p849_p1 = scmp.lt.s32.totalorder %s843_s1, %s843_s1 }
  0x3e   :  { %p850_p2 = por %p849_p1, %p848_p0 }
  0x40   :  { %p851_p3 = pnand %p850_p2, %p844_p13 }
  0x42   :  { %854 = shalt.err (!%p851_p3)
}
  0x43   :  { %s891_s3 = smov 64   ;;  %s892_s11 = smov 4  }
  0x44   :  { %65 = dma.hbm_to_vmem [thread:$0]  %s1017_s5, 2048, %s60_s17, [#allocation9], %s891_s3, %s891_s3, %s892_s11  }
  0x45   :  { %877 = dma.done.wait [#allocation3], 128  }
  0x46   :  { %878 = vsyncadd [#allocation3], 4294967168 }
  0x47   :  { %879 = dma.done.wait [#allocation6], 4352  }
  0x48   :  { %880 = vsyncadd [#allocation6], 4294962944 }
  0x49   :  { %881 = dma.done.wait [#allocation9], 2048  }
  0x4a   :  { %882 = vsyncadd [#allocation9], 4294965248  ;;  %v893_v0 = vmov 0   ;;  %v696_v1 = vld [vmem:[#allocation5 + $0x4] ss:$8 sps:$4 sm:$0xff]   ;;  %v81_v3 = vld [vmem:[#allocation2] sm:$0xff]  ;;  %v87_v49 = vlaneseq }
  0x4b   :  { %143 = vmatprep.mubr.bf16.mxu0 %v893_v0  ;;  %v698_v2 = vld [vmem:[#allocation5] ss:$8 sps:$4 sm:$0xff]   ;;  %111 = vmatprep.subr.bf16.mxu0 %v696_v1  ;;  %v82_v4 = vpack.c.bf16 %v81_v3, %v81_v3  ;;  %v699_v5 = vld [vmem:[#allocation7 + $0x4] ss:$8 sps:$4 sm:$0xff]   ;;  %v701_v6 = vld [vmem:[#allocation7] ss:$8 sps:$4 sm:$0xff]  }
  0x4c   :  { %112 = vmatpush1.bf16.msra.mxu0 %v698_v2  ;;  %vm107_vm0 = vcmask 130048   ;;  %v702_v7 = vld [vmem:[#allocation7 + $0x14] ss:$8 sps:$4 sm:$0xff]   ;;  %360 = vmatprep.subr.bf16.mxu1 %v699_v5  ;;  %v704_v8 = vld [vmem:[#allocation7 + $0x10] ss:$8 sps:$4 sm:$0xff]   ;;  %v747_v37 = vld [vmem:[#allocation8 + $0x40] sm:$0xff]  }
  0x4d   :  { %361 = vmatpush1.bf16.msra.mxu1 %v701_v6  ;;  %v705_v9 = vld [vmem:[#allocation7 + $0x24] ss:$8 sps:$4 sm:$0xff]   ;;  %v707_v10 = vld [vmem:[#allocation7 + $0x20] ss:$8 sps:$4 sm:$0xff]   ;;  %v708_v11 = vld [vmem:[#allocation7 + $0x34] ss:$8 sps:$4 sm:$0xff]   ;;  %664 = vmatprep.subr.bf16.mxu0 %v747_v37 }
  0x4e   :  { %362 = vmatprep.subr.bf16.mxu1 %v702_v7  ;;  %v710_v12 = vld [vmem:[#allocation7 + $0x30] ss:$8 sps:$4 sm:$0xff]   ;;  %v711_v13 = vld [vmem:[#allocation7 + $0x44] ss:$8 sps:$4 sm:$0xff]   ;;  %v713_v14 = vld [vmem:[#allocation7 + $0x40] ss:$8 sps:$4 sm:$0xff]  }
  0x4f   :  { %614 = vmatmul.mubr.msk.bf16.vlgmr.msra.gmra.mrb[0].mxu0 %vm107_vm0, %v82_v4  ;;  %v714_v15 = vld [vmem:[#allocation7 + $0x54] ss:$8 sps:$4 sm:$0xff]   ;;  %v716_v16 = vld [vmem:[#allocation7 + $0x50] ss:$8 sps:$4 sm:$0xff]   ;;  %v717_v17 = vld [vmem:[#allocation7 + $0x64] ss:$8 sps:$4 sm:$0xff]  }
  0x50   :  { %v719_v18 = vld [vmem:[#allocation7 + $0x60] ss:$8 sps:$4 sm:$0xff]   ;;  %v720_v19 = vld [vmem:[#allocation7 + $0x74] ss:$8 sps:$4 sm:$0xff]   ;;  %v722_v20 = vld [vmem:[#allocation7 + $0x70] ss:$8 sps:$4 sm:$0xff]  }
  0x51   :  { %363 = vmatpush1.bf16.msra.mxu1 %v704_v8  ;;  %v723_v21 = vld [vmem:[#allocation7 + $0x84] ss:$8 sps:$4 sm:$0xff]   ;;  %v725_v22 = vld [vmem:[#allocation7 + $0x80] ss:$8 sps:$4 sm:$0xff]   ;;  %v726_v23 = vld [vmem:[#allocation7 + $0x94] ss:$8 sps:$4 sm:$0xff]  }
  0x52   :  { %364 = vmatprep.subr.bf16.mxu1 %v705_v9  ;;  %v728_v24 = vld [vmem:[#allocation7 + $0x90] ss:$8 sps:$4 sm:$0xff]   ;;  %v729_v25 = vld [vmem:[#allocation7 + $0xa4] ss:$8 sps:$4 sm:$0xff]   ;;  %v731_v26 = vld [vmem:[#allocation7 + $0xa0] ss:$8 sps:$4 sm:$0xff]  }
  0x53   :  { %v732_v27 = vld [vmem:[#allocation7 + $0xb4] ss:$8 sps:$4 sm:$0xff]   ;;  %v734_v28 = vld [vmem:[#allocation7 + $0xb0] ss:$8 sps:$4 sm:$0xff]   ;;  %v735_v29 = vld [vmem:[#allocation7 + $0xc4] ss:$8 sps:$4 sm:$0xff]  }
  0x54   :  { %v737_v30 = vld [vmem:[#allocation7 + $0xc0] ss:$8 sps:$4 sm:$0xff]   ;;  %v738_v31 = vld [vmem:[#allocation7 + $0xd4] ss:$8 sps:$4 sm:$0xff]   ;;  %v740_v32 = vld [vmem:[#allocation7 + $0xd0] ss:$8 sps:$4 sm:$0xff]  }
  0x55   :  { %365 = vmatpush1.bf16.msra.mxu1 %v707_v10  ;;  %v741_v33 = vld [vmem:[#allocation7 + $0xe4] ss:$8 sps:$4 sm:$0xff]   ;;  %v743_v34 = vld [vmem:[#allocation7 + $0xe0] ss:$8 sps:$4 sm:$0xff]   ;;  %v744_v35 = vld [vmem:[#allocation7 + $0xf4] ss:$8 sps:$4 sm:$0xff]  }
  0x56   :  { %366 = vmatprep.subr.bf16.mxu1 %v708_v11  ;;  %v746_v36 = vld [vmem:[#allocation7 + $0xf0] ss:$8 sps:$4 sm:$0xff]   ;;  %v748_v38 = vld [vmem:[#allocation8] sm:$0xff]   ;;  %v749_v39 = vld [vmem:[#allocation8 + $0x48] sm:$0xff]   ;;  %v88_v50 = vshrl.u32 %v87_v49, 7 }
  0x57   :  { %665 = vmatpush3.bf16.msra.mxu0 %v748_v38  ;;  %v750_v40 = vld [vmem:[#allocation8 + $0x8] sm:$0xff]   ;;  %v751_v41 = vld [vmem:[#allocation8 + $0x50] sm:$0xff]   ;;  %v753_v43 = vld [vmem:[#allocation8 + $0x58] sm:$0xff]  }
  0x58   :  { %666 = vmatprep.subr.bf16.mxu0 %v749_v39  ;;  %v752_v42 = vld [vmem:[#allocation8 + $0x10] sm:$0xff]   ;;  %v754_v44 = vld [vmem:[#allocation8 + $0x18] sm:$0xff]   ;;  %v755_v45 = vld [vmem:[#allocation8 + $0x60] sm:$0xff]   ;;  %v89_v51 = vsub.s32 0, %v88_v50  ;;  %v93_v53 = vsub.s32 1, %v88_v50 }
  0x59   :  { %367 = vmatpush1.bf16.msra.mxu1 %v710_v12  ;;  %v756_v46 = vld [vmem:[#allocation8 + $0x20] sm:$0xff]   ;;  %v757_v47 = vld [vmem:[#allocation8 + $0x68] sm:$0xff]   ;;  %v759_v2 = vld [vmem:[#allocation8 + $0x70] sm:$0xff]  }
  0x5a   :  { %368 = vmatprep.subr.bf16.mxu1 %v711_v13  ;;  %v758_v48 = vld [vmem:[#allocation8 + $0x28] sm:$0xff]   ;;  %v760_v3 = vld [vmem:[#allocation8 + $0x30] sm:$0xff]   ;;  %v761_v4 = vld [vmem:[#allocation8 + $0x78] sm:$0xff]  }
  0x5b   :  { %667 = vmatpush3.bf16.msra.mxu0 %v750_v40  ;;  %v85_v52 = vld [vmem:[%s1014_s2] sm:$0x3]  ;;  %v762_v5 = vld [vmem:[#allocation8 + $0x38] sm:$0xff]  }
  0x5c   :  { %668 = vmatprep.subr.bf16.mxu0 %v751_v41  ;;  %v90_v54 = vrot.slane %v85_v52, %v89_v51  ;;  %v94_v55 = vrot.slane %v85_v52, %v93_v53  ;;  %v188_v6 = vld [vmem:[%s1016_s4] sm:$0x3]  ;;  %s894_s4 = smov [#allocation10]  }
  0x5d   :  { %369 = vmatpush1.bf16.msra.mxu1 %v713_v14  ;;  %v193_v7 = vrot.slane %v188_v6, %v89_v51  ;;  %v197_v8 = vrot.slane %v188_v6, %v93_v53  ;;  %s601_s30 = sshll.u32 %s894_s4, 4  ;;  %s602_s30 = int_to_ptr.vmem [resolvable:$true] %s601_s30 }
  0x5e   :  { %370 = vmatprep.subr.bf16.mxu1 %v714_v15  ;;  %p860_p5 = scmp.lt.s32.totalorder %s602_s30, %s602_s30 }
  0x5f   :  { %669 = vmatpush3.bf16.msra.mxu0 %v752_v42 }
  0x60   :  { %670 = vmatprep.subr.bf16.mxu0 %v753_v43 }
  0x61   :  { %371 = vmatpush1.bf16.msra.mxu1 %v716_v16 }
  0x62   :  { %372 = vmatprep.subr.bf16.mxu1 %v717_v17 }
  0x63   :  { %671 = vmatpush3.bf16.msra.mxu0 %v754_v44 }
  0x64   :  { %672 = vmatprep.subr.bf16.mxu0 %v755_v45 }
  0x65   :  { %373 = vmatpush1.bf16.msra.mxu1 %v719_v18 }
  0x66   :  { %374 = vmatprep.subr.bf16.mxu1 %v720_v19  ;;  %v581_v19 = vand.u32 127, %v87_v49 }
  0x67   :  { %673 = vmatpush3.bf16.msra.mxu0 %v756_v46 }
  0x68   :  { %674 = vmatprep.subr.bf16.mxu0 %v757_v47  ;;  %vm582_vm1 = vcmp.lt.s32.totalorder %v581_v19, 3 }
  0x69   :  { %375 = vmatpush1.bf16.msra.mxu1 %v722_v20 }
  0x6a   :  { %376 = vmatprep.subr.bf16.mxu1 %v723_v21 }
  0x6b   :  { %675 = vmatpush3.bf16.msra.mxu0 %v758_v48 }
  0x6c   :  { %676 = vmatprep.subr.bf16.mxu0 %v759_v2 }
  0x6d   :  { %377 = vmatpush1.bf16.msra.mxu1 %v725_v22  ;;  %v647_v22 = vld [vmem:[%s1018_s6] ss:$0 sm:$0xff]  ;;  %s855_s6 = scalar_lea.vmem %s602_s30, 128 }
  0x6e   :  { %378 = vmatprep.subr.bf16.mxu1 %v726_v23  ;;  %p856_p4 = scmp.ne.s32.totalorder %s602_s30, %s855_s6  ;;  %p861_p6 = scmp.lt.s32.totalorder %s855_s6, %s855_s6 }
  0x6f   :  { %677 = vmatpush3.bf16.msra.mxu0 %v760_v3 }
  0x70   :  { %678 = vmatprep.subr.bf16.mxu0 %v761_v4  ;;  %p862_p7 = por %p861_p6, %p860_p5 }
  0x71   :  { %379 = vmatpush1.bf16.msra.mxu1 %v728_v24 }
  0x72   :  { %380 = vmatprep.subr.bf16.mxu1 %v729_v25  ;;  %p863_p8 = pnand %p862_p7, %p856_p4 }
  0x73   :  { %679 = vmatpush3.bf16.msra.mxu0 %v762_v5 }
  0x75   :  { %381 = vmatpush1.bf16.msra.mxu1 %v731_v26 }
  0x76   :  { %382 = vmatprep.subr.bf16.mxu1 %v732_v27 }
  0x79   :  { %383 = vmatpush1.bf16.msra.mxu1 %v734_v28 }
  0x7a   :  { %384 = vmatprep.subr.bf16.mxu1 %v735_v29 }
  0x7d   :  { %385 = vmatpush1.bf16.msra.mxu1 %v737_v30 }
  0x7e   :  { %386 = vmatprep.subr.bf16.mxu1 %v738_v31 }
  0x81   :  { %387 = vmatpush1.bf16.msra.mxu1 %v740_v32 }
  0x82   :  { %388 = vmatprep.subr.bf16.mxu1 %v741_v33 }
  0x85   :  { %389 = vmatpush1.bf16.msra.mxu1 %v743_v34 }
  0x86   :  { %390 = vmatprep.subr.bf16.mxu1 %v744_v35 }
  0x89   :  { %391 = vmatpush1.bf16.msra.mxu1 %v746_v36 }
 0x122   :  { %v145_v56 = vpop.f32.mrb[0].mxu0 }
 0x123   :  { %v146_v57 = vadd.f32 %v145_v56, %v90_v54  ;;  %v147_v58 = vpop.f32.mrb[1].mxu0 }
 0x124   :  { %v148_v59 = vadd.f32 %v147_v58, %v94_v55  ;;  %v149_v60 = vpop.f32.mrb[2].mxu0 }
 0x125   :  { %v152_v61 = vmax.f32 %v146_v57, 0.0  ;;  %v150_v62 = vpop.f32.mrb[3].mxu0 }
 0x126   :  { %v153_v63 = vmax.f32 %v148_v59, 0.0 }
 0x127   :  { %v154_v1 = vpack.c.bf16 %v152_v61, %v152_v61 }
 0x128   :  { %v155_v0 = vpack.c.bf16 %v153_v63, %v153_v63 }
 0x12a   :  { %392 = vmatprep.mubr.bf16.mxu1 %v155_v0 }
 0x12b   :  { %393 = vmatmul.mubr.bf16.vlgmr.msra.gmra.mrb[0].mxu1 %v154_v1 }
 0x1fe   :  { %v394_v9 = vpop.f32.mrb[0].mxu1 }
 0x1ff   :  { %v395_v10 = vadd.f32 %v394_v9, %v193_v7  ;;  %v396_v11 = vpop.f32.mrb[1].mxu1 }
 0x200   :  { %v397_v12 = vadd.f32 %v396_v11, %v197_v8  ;;  %v398_v13 = vpop.f32.mrb[2].mxu1 }
 0x201   :  { %v401_v14 = vmax.f32 %v395_v10, 0.0  ;;  %v399_v15 = vpop.f32.mrb[3].mxu1 }
 0x202   :  { %v402_v16 = vmax.f32 %v397_v12, 0.0 }
 0x203   :  { %v403_v18 = vpack.c.bf16 %v401_v14, %v401_v14 }
 0x204   :  { %v404_v17 = vpack.c.bf16 %v402_v16, %v402_v16 }
 0x206   :  { %572 = vmatprep.mubr.bf16.mxu0 %v404_v17 }
 0x207   :  { %573 = vmatmul.mubr.bf16.vlgmr.msra.gmra.mrb[4].mxu0 %v403_v18 }
 0x2da   :  { %v680_v20 = vpop.f32.mrb[4].mxu0 }
 0x2db   :  { %v681_v21 = vpop.f32.mrb[5].mxu0 }
 0x2dc   :  { %v682_v23 = vadd.f32 %v681_v21, %v680_v20  ;;  %v683_v24 = vpop.f32.mrb[6].mxu0 }
 0x2dd   :  { %v684_v25 = vpop.f32.mrb[7].mxu0 }
 0x2de   :  { %v575_v26 = vadd.f32 %v682_v23, %v647_v22 }
 0x2e0   :  { %v583_v27 = vsel %vm582_vm1, %v575_v26, -1e+30 }
 0x2e1   :  { %584 = vmax.xlane.f32.xlu0 %v583_v27 }
 0x36e   :  { %v585_v28 = vpop.xlane.xlu0 %584 }
 0x36f   :  { %v586_v29 = vsub.f32 %v583_v27, %v585_v28 }
 0x371   :  { %v587_v30 = vmul.f32 1.442695, %v586_v29 }
 0x373   :  { %763 = vpow2.f32 %v587_v30 }
 0x37d   :  { %v764_v31 = vpop.eup %763 }
 0x37e   :  { %589 = vadd.xlane.f32.xlu0 %v764_v31 }
 0x40b   :  { %v590_v32 = vpop.xlane.xlu0 %589 }
 0x40c   :  { %765 = vrcp.f32 %v590_v32 }
 0x416   :  { %v766_v33 = vpop.eup %765 }
 0x417   :  { %v592_v34 = vmul.f32 %v766_v33, %v764_v31 }
 0x419   :  { %v593_v35 = vsel %vm582_vm1, %v592_v34, %v575_v26 }
 0x41a   :  { %594 = vst [vmem:[#allocation10] sm:$0xff] %v593_v35 }
 0x41b   :  { %866 = shalt.err (!%p863_p8)
}
 0x41c   :  { %s867_s10 = scalar_lea.hbm %s1019_s7, 128 }
 0x41d   :  { %p868_p9 = scmp.ne.s32.totalorder %s1019_s7, %s867_s10  ;;  %p871_p10 = scmp.lt.u32.totalorder %s867_s10, %s1019_s7 }
 0x41f   :  { %p873_p11 = pnand %p871_p10, %p868_p9 }
 0x421   :  { %876 = shalt.err (!%p873_p11)
}
 0x422   :  { %604 = dma.vmem_to_hbm [thread:$0]  %s602_s30, 128, %s1019_s7, [#allocation4]  }
 0x423   :  { %883 = dma.done.wait [#allocation4], 128  }
 0x424   :  { %884 = vsyncadd [#allocation4], 4294967168 }
 0x425   :  { %608 = vsyncpa [#allocation3], 1 }
 0x426   :  { %609 = vsyncpa [#allocation6], 1 }
 0x427   :  { %610 = vsyncpa [#allocation9], 1 }
 0x428   :  { %611 = vsyncpa [#allocation4], 1 }

</bundles_post_ra>
